<compile_context>
chip_gen: v7x
topology: tpu7x:2x2x1
jax: 0.10.0
libtpu: 0.0.40
codegen_flags: <defaults>
</compile_context>

<pallas_src>
import jax
import jax.numpy as jnp
from jax.experimental import pallas as pl
from jax.experimental.pallas import tpu as pltpu


def _round_up(x, m):
    return ((x + m - 1) // m) * m


def _pick_tile(dim_padded, target):
    """Largest multiple of 128 that divides `dim_padded` and is <= target."""
    q = dim_padded // 128
    tmax = max(target // 128, 1)
    best = 1
    for d in range(1, min(q, tmax) + 1):
        if q % d == 0:
            best = d
    return best * 128


def _bmm_kernel_out_acc(x1_ref, x2_ref, o_ref):
    # f32 output: accumulate directly into the VMEM-resident output block.
    # Batch dim is squeezed: x1_ref (tm, tk), x2_ref (tk, tn), o_ref (tm, tn).
    k = pl.program_id(3)

    @pl.when(k == 0)
    def _():
        o_ref[...] = jnp.zeros_like(o_ref)

    o_ref[...] += jnp.dot(
        x1_ref[...], x2_ref[...], preferred_element_type=jnp.float32
    )


def _bmm_kernel_scratch_acc(x1_ref, x2_ref, o_ref, acc_ref):
    # Non-f32 output: f32 scratch accumulator, cast on the last K step.
    k = pl.program_id(3)

    @pl.when(k == 0)
    def _():
        acc_ref[...] = jnp.zeros_like(acc_ref)

    acc_ref[...] += jnp.dot(
        x1_ref[...], x2_ref[...], preferred_element_type=jnp.float32
    )

    @pl.when(k == pl.num_programs(3) - 1)
    def _():
        o_ref[...] = acc_ref[...].astype(o_ref.dtype)


def matmul_sparse_forward(x1, x2, *, tm=512, tn=512, tk=512, use_bf16_mxu=False):
    """Batched matmul: x1 [B, M, K] @ x2 [B, K, N] -> [B, M, N]."""
    squeeze_batch = False
    if x1.ndim == 2 and x2.ndim == 2:
        x1, x2 = x1[None], x2[None]
        squeeze_batch = True
    assert x1.ndim == 3 and x2.ndim == 3
    B, M, K = x1.shape
    B2, K2, N = x2.shape
    assert B == B2 and K == K2

    # Output dtype follows the ORIGINAL inputs (forward is torch.matmul).
    out_dtype = jnp.result_type(x1.dtype, x2.dtype)

    if use_bf16_mxu:
        # Perf option: bf16 MXU feeds + f32 accumulation. Changes numerics
        # (input rounding only), so it is opt-in.
        x1 = x1.astype(jnp.bfloat16)
        x2 = x2.astype(jnp.bfloat16)
        out_dtype = jnp.float32 if out_dtype == jnp.float32 else out_dtype

    # Pad only to the 128-lane layout granularity (K pad must be zeros for
    # reduction correctness; M/N padded rows/cols are sliced away).
    Mp, Kp, Np = _round_up(M, 128), _round_up(K, 128), _round_up(N, 128)
    if (Mp, Kp) != (M, K):
        x1 = jnp.pad(x1, ((0, 0), (0, Mp - M), (0, Kp - K)))
    if (Kp, Np) != (K, N):
        x2 = jnp.pad(x2, ((0, 0), (0, Kp - K), (0, Np - N)))

    # Tiles: 128-multiple divisors of the padded dims, capped at the targets.
    tm = _pick_tile(Mp, tm)
    tn = _pick_tile(Np, tn)
    tk = _pick_tile(Kp, tk)

    # v7x megacore: keep the parallel part of the grid splittable across the
    # two TensorCores when possible.
    if B * (Mp // tm) * (Np // tn) == 1:
        if Np // 128 >= 2:
            tn = _pick_tile(Np, Np // 2)
        elif Mp // 128 >= 2:
            tm = _pick_tile(Mp, Mp // 2)

    grid = (B, Mp // tm, Np // tn, Kp // tk)

    in_item = jnp.dtype(x1.dtype).itemsize
    out_item = jnp.dtype(out_dtype).itemsize

    # VMEM limit from the actual tile footprint (double-buffered inputs +
    # output block), capped at 48 MiB (v7x physical VMEM is 64 MiB / TC).
    tile_bytes = 2 * (tm * tk + tk * tn) * in_item + 2 * tm * tn * out_item
    vmem_limit = int(min(max(32 * 1024 * 1024, tile_bytes + 8 * 1024 * 1024),
                         48 * 1024 * 1024))

    # Honest tiled-traffic estimate: x1 re-read Np/tn times, x2 Mp/tm times.
    flops = 2 * B * Mp * Np * Kp
    bytes_accessed = B * (
        Mp * Kp * in_item * (Np // tn)
        + Kp * Np * in_item * (Mp // tm)
        + Mp * Np * out_item
    )

    use_out_acc = out_dtype == jnp.float32
    kernel = _bmm_kernel_out_acc if use_out_acc else _bmm_kernel_scratch_acc
    scratch_shapes = [] if use_out_acc else [pltpu.VMEM((tm, tn), jnp.float32)]

    out_padded = pl.pallas_call(
        kernel,
        out_shape=jax.ShapeDtypeStruct((B, Mp, Np), out_dtype),
        grid_spec=pltpu.PrefetchScalarGridSpec(
            num_scalar_prefetch=0,
            grid=grid,
            in_specs=[
                pl.BlockSpec(
                    (pl.Squeezed(), tm, tk), lambda b, i, j, k: (b, i, k)
                ),
                pl.BlockSpec(
                    (pl.Squeezed(), tk, tn), lambda b, i, j, k: (b, k, j)
                ),
            ],
            out_specs=pl.BlockSpec(
                (pl.Squeezed(), tm, tn), lambda b, i, j, k: (b, i, j)
            ),
            scratch_shapes=scratch_shapes,
        ),
        compiler_params=pltpu.CompilerParams(
            dimension_semantics=("parallel", "parallel", "parallel", "arbitrary"),
            vmem_limit_bytes=vmem_limit,
        ),
        cost_estimate=pl.CostEstimate(
            flops=flops, transcendentals=0, bytes_accessed=bytes_accessed
        ),
    )(x1, x2)

    out = out_padded
    if (Mp, Np) != (M, N):
        out = out[:, :M, :N]
    if squeeze_batch:
        out = out[0]
    return out


if __name__ == "__main__":
    key = jax.random.PRNGKey(0)
    k1, k2, k3, k4 = jax.random.split(key, 4)

    # Case 1: small, non-aligned shapes (exercises 128-padding path).
    B, M, K, N = 2, 16, 32, 64
    x1 = jax.random.normal(k1, (B, M, K), dtype=jnp.float32)
    x2 = jax.random.normal(k2, (B, K, N), dtype=jnp.float32)
    y = jax.block_until_ready(matmul_sparse_forward(x1, x2))
    y_ref = jnp.matmul(x1, x2)
    assert y.shape == (B, M, N)
    assert jnp.allclose(y, y_ref, atol=1e-4, rtol=1e-4)

    # Case 2: ragged M/N/K, forced tk=128 to exercise the K-axis accumulation
    # into the VMEM-resident output block across multiple grid steps.
    B, M, K, N = 2, 200, 384, 320
    a = jax.random.normal(k3, (B, M, K), dtype=jnp.float32)
    b = jax.random.normal(k4, (B, K, N), dtype=jnp.float32)
    z = jax.block_until_ready(matmul_sparse_forward(a, b, tk=128))
    z_ref = jnp.matmul(a, b)
    assert z.shape == (B, M, N)
    rel_err = jnp.max(jnp.abs(z - z_ref)) / (jnp.max(jnp.abs(z_ref)) + 1e-6)
    assert float(rel_err) < 1e-3

    # Case 3: bf16 MXU-feed fast path (f32 accumulation, looser tolerance).
    z16 = jax.block_until_ready(matmul_sparse_forward(a, b, use_bf16_mxu=True))
    assert z16.dtype == jnp.float32 and z16.shape == (B, M, N)
    rel_err16 = jnp.max(jnp.abs(z16 - z_ref)) / (jnp.max(jnp.abs(z_ref)) + 1e-6)
    assert float(rel_err16) < 2e-2

    print("KERNEL_OK")
</pallas_src>

<mosaic_0001>
module attributes {stable_mosaic.version = 11 : i64} {
  func.func @_bmm_kernel_out_acc(%arg0: i32, %arg1: i32, %arg2: i32, %arg3: i32, %arg4: memref<1x128x128xf32, #tpu.memory_space<vmem>>, %arg5: memref<1x128x128xf32, #tpu.memory_space<vmem>>, %arg6: memref<1x128x128xf32, #tpu.memory_space<vmem>>) attributes {dimension_semantics = [#tpu.dimension_semantics<parallel>, #tpu.dimension_semantics<parallel>, #tpu.dimension_semantics<parallel>, #tpu.dimension_semantics<arbitrary>], iteration_bounds = array<i64: 2, 1, 1, 1>, scalar_prefetch = 0 : i64, scratch_operands = 0 : i64, tpu.core_type = #tpu.core_type<tc>, window_params = [{transform_indices = @transform_0, window_bounds = array<i64: 1, 128, 128>}, {transform_indices = @transform_1, window_bounds = array<i64: 1, 128, 128>}, {transform_indices = @transform_2, window_bounds = array<i64: 1, 128, 128>}]} {
    %c0_i32 = arith.constant 0 : i32
    %0 = arith.cmpi eq, %arg3, %c0_i32 : i32
    %1 = arith.extui %0 : i1 to i32
    %c0_i32_0 = arith.constant 0 : i32
    %2 = arith.cmpi ne, %1, %c0_i32_0 : i32
    scf.if %2 {
      %cst_12 = arith.constant 0.000000e+00 : f32
      %14 = vector.broadcast %cst_12 : f32 to vector<128x128xf32>
      %c0_13 = arith.constant 0 : index
      %c0_14 = arith.constant 0 : index
      %c0_15 = arith.constant 0 : index
      %15 = vector.load %arg6[%c0_13, %c0_14, %c0_15] : memref<1x128x128xf32, #tpu.memory_space<vmem>>, vector<1x128x128xf32>
      %16 = vector.shape_cast %15 : vector<1x128x128xf32> to vector<128x128xf32>
      %17 = vector.shape_cast %14 : vector<128x128xf32> to vector<1x128x128xf32>
      tpu.vector_store %arg6[%c0_13, %c0_14, %c0_15], %17 {strides = array<i32>} : memref<1x128x128xf32, #tpu.memory_space<vmem>>, vector<1x128x128xf32>,
    } else {
    }
    %c0 = arith.constant 0 : index
    %c0_1 = arith.constant 0 : index
    %c0_2 = arith.constant 0 : index
    %3 = vector.load %arg6[%c0, %c0_1, %c0_2] : memref<1x128x128xf32, #tpu.memory_space<vmem>>, vector<1x128x128xf32>
    %4 = vector.shape_cast %3 : vector<1x128x128xf32> to vector<128x128xf32>
    %c0_3 = arith.constant 0 : index
    %c0_4 = arith.constant 0 : index
    %c0_5 = arith.constant 0 : index
    %5 = vector.load %arg4[%c0_3, %c0_4, %c0_5] : memref<1x128x128xf32, #tpu.memory_space<vmem>>, vector<1x128x128xf32>
    %6 = vector.shape_cast %5 : vector<1x128x128xf32> to vector<128x128xf32>
    %c0_6 = arith.constant 0 : index
    %c0_7 = arith.constant 0 : index
    %c0_8 = arith.constant 0 : index
    %7 = vector.load %arg5[%c0_6, %c0_7, %c0_8] : memref<1x128x128xf32, #tpu.memory_space<vmem>>, vector<1x128x128xf32>
    %8 = vector.shape_cast %7 : vector<1x128x128xf32> to vector<128x128xf32>
    %cst = arith.constant dense<0.000000e+00> : vector<128x128xf32>
    %9 = tpu.matmul %6, %8, %cst {dimension_numbers = #tpu.dot_dimension_numbers<[1], [0], [0], [1], [0, 0, 1, 1], [], []>} : vector<128x128xf32>, vector<128x128xf32>, vector<128x128xf32> -> vector<128x128xf32>
    %10 = arith.addf %4, %9 : vector<128x128xf32>
    %c0_9 = arith.constant 0 : index
    %c0_10 = arith.constant 0 : index
    %c0_11 = arith.constant 0 : index
    %11 = vector.load %arg6[%c0_9, %c0_10, %c0_11] : memref<1x128x128xf32, #tpu.memory_space<vmem>>, vector<1x128x128xf32>
    %12 = vector.shape_cast %11 : vector<1x128x128xf32> to vector<128x128xf32>
    %13 = vector.shape_cast %10 : vector<128x128xf32> to vector<1x128x128xf32>
    tpu.vector_store %arg6[%c0_9, %c0_10, %c0_11], %13 {strides = array<i32>} : memref<1x128x128xf32, #tpu.memory_space<vmem>>, vector<1x128x128xf32>,
    return
  }
  func.func @transform_0(%arg0: i32, %arg1: i32, %arg2: i32, %arg3: i32) -> (i32, i32, i32) {
    %c0_i32 = arith.constant 0 : i32
    return %arg0, %arg1, %arg3 : i32, i32, i32
  }
  func.func @transform_1(%arg0: i32, %arg1: i32, %arg2: i32, %arg3: i32) -> (i32, i32, i32) {
    %c0_i32 = arith.constant 0 : i32
    return %arg0, %arg3, %arg2 : i32, i32, i32
  }
  func.func @transform_2(%arg0: i32, %arg1: i32, %arg2: i32, %arg3: i32) -> (i32, i32, i32) {
    %c0_i32 = arith.constant 0 : i32
    return %arg0, %arg1, %arg2 : i32, i32, i32
  }
}

</mosaic_0001>

<bundles_post_ra>
// kernel: tpu_custom_call.1
= control target key start
LH: loop header
LB: loop body
LE: loop exit
PB: predicated region body
PF: predicated region fallthrough
CT: control target
= control target key end

     0   :  { %7 = vsyncpa [#allocation3], 0  ;;  %s1329_s0 = inlined_call_operand.hbm [shape: f32[2,128,128], index: 0, kind: input, shape index: {}]   ;;  %s1330_s1 = inlined_call_operand.hbm [shape: f32[2,128,128], index: 1, kind: input, shape index: {}]   ;;  %s1331_s2 = inlined_call_operand.hbm [shape: f32[2,128,128], index: 2, kind: output, shape index: {}]  }
   0x1   :  { %9 = vsyncpa [#allocation3 + $0x1], 0 }
   0x2   :  { %10 = vsyncpa [#allocation6], 0 }
   0x3   :  { %12 = vsyncpa [#allocation6 + $0x1], 0 }
   0x4   :  { %13 = vsyncpa [#allocation4], 0 }
   0x5   :  { %15 = vsyncpa [#allocation4 + $0x1], 0  ;;  %s1033_s9 = smov 0   ;;  %s1035_s10 = smov 0  }
   0x6   :  { %s1037_s11 = smov 0   ;;  %s1039_s12 = smov 0  }
   0x7   :  { %s1041_s13 = smov 0   ;;  %s1043_s14 = smov 0  }
   0x8 LB: > { %s633_s15 = sadd.s32 4294967295, %s1009_s14   ;;  %s634_s16 = sadd.s32 4294967294, %s1009_s14   ;;  %s1009_s14 = sphi %s1043_s14, %s21_s14   ;;  %s1005_s13 = sphi %s1041_s13, %s1349_s13   ;;  %s1001_s12 = sphi %s1039_s12, %s1348_s12   ;;  %s997_s11 = sphi %s1037_s11, %s1347_s11   ;;  %s993_s10 = sphi %s1035_s10, %s1346_s10   ;;  %s989_s9 = sphi %s1033_s9, %s1345_s9  }
   0x9   : > { %s47_s17 = sadd.s32 1, %s1005_s13  ;;  %s58_s18 = sadd.s32 1, %s997_s11 }
   0xa   : > { %p49_p0 = scmp.ge.s32.totalorder %s47_s17, 2  ;;  %p65_p1 = scmp.ne.s32.totalorder %s997_s11, %s993_s10 }
   0xb   : > { %p66_p2 = scmp.eq.s32.totalorder %s1009_s14, 0  ;;  %p71_p3 = scmp.ne.s32.totalorder %s993_s10, %s989_s9 }
   0xc   : > { %s1351_s17 = smov (%p49_p0, %s47_s17), 0  ;;  %p72_p5 = scmp.eq.s32.totalorder %s633_s15, 0 }
   0xd   : > { %p1074_p4 = por %p66_p2, %p65_p1  ;;  %s51_s20 = ssub.s32 %s1005_s13, %s1351_s17 }
   0xe   : > { %p129_p6 = scmp.eq.s32.totalorder %s633_s15, 1  ;;  %p56_p7 = scmp.eq.s32.totalorder %s51_s20, 0 }
   0xf   : > { %p1080_p8 = por %p72_p5, %p71_p3  ;;  %p135_p10 = scmp.eq.s32.totalorder %s634_s16, 1 }
  0x10   : > { %p1084_p9 = por %p129_p6, %p65_p1  ;;  %p808_p13 = scmp.lt.s32.totalorder %s1009_s14, 2 }
  0x11   : > { %s1335_s21 = scalar_select %p1080_p8, 1, 0 }
  0x12   : > { %s1336_s22 = scalar_select %p1084_p9, 1, 0 }
  0x13   : > { %s1089_s23 = scalar_select %p56_p7, %s997_s11, %s58_s18  }
  0x14   : > { %p1091_p11 = por %p135_p10, %p71_p3  ;;  %s1098_s25 = sand.u32 1, %s997_s11  }
  0x15   : > { %s637_s26 = sshll.u32 %s1098_s25, 7  ;;  %s652_s27 = sshll.u32 %s1005_s13, 11 }
  0x16   : > { %s1337_s24 = scalar_select %p1091_p11, 1, 0 }
  0x17   : > { %s1107_s30 = scalar_lea.hbm %s1329_s0, %s652_s27  ;;  %s159_s3 = scalar_lea.vmem [#allocation2], %s637_s26 }
  0x18   : > { %s169_s4 = sshll.u32 %s159_s3, 4  ;;  %p1115_p0 = pnand %p808_p13, %p1074_p4  ;;  %s1111_s4 = int_to_ptr.vmem [resolvable:$true] %s169_s4 }
  0x19   : > { %s156_s6 = scalar_lea.sflag [#allocation3], %s1098_s25  ;;  %s863_s7 = scalar_lea.hbm %s1107_s30, 2048 }
  0x1a   : > { %p864_p2 = scmp.ne.s32.totalorder %s1107_s30, %s863_s7  ;;  %p865_p3 = pneg %p1115_p0 }
  0x1b   : > { %s868_s16 = scalar_lea.hbm %s1329_s0, 4096  ;;  %p869_p4 = scmp.lt.u32.totalorder %s1107_s30, %s1329_s0 }
  0x1c   : > { %p866_p5 = pnand %p865_p3, %p864_p2  ;;  %p870_p7 = scmp.lt.u32.totalorder %s868_s16, %s863_s7 }
  0x1d   : > { %p872_p13 = scmp.lt.u32.totalorder %s863_s7, %s1107_s30 }
  0x1e   : > { %p867_p6 = pneg %p866_p5  ;;  %p871_p10 = por %p870_p7, %p869_p4 }
  0x20   : > { %p873_p12 = por %p872_p13, %p871_p10 }
  0x22   : > { %p874_p1 = pnand %p873_p12, %p867_p6 }
  0x24   : > { %877 = shalt.err (!%p874_p1)
}
  0x25   : > { %s878_s20 = scalar_lea.vmem %s1111_s4, 2048  ;;  %s1011_s28 = smov [#allocation2]  }
  0x26   : > { %p879_p2 = scmp.ne.s32.totalorder %s1111_s4, %s878_s20  ;;  %s883_s29 = sshll.u32 %s1011_s28, 4  ;;  %s884_s29 = int_to_ptr.vmem [resolvable:$false] %s883_s29 }
  0x27   : > { %s885_s3 = scalar_lea.vmem %s884_s29, 4096  ;;  %p886_p9 = scmp.lt.s32.totalorder %s1111_s4, %s884_s29 }
  0x28   : > { %p881_p5 = pnand %p879_p2, %p865_p3  ;;  %p887_p4 = scmp.lt.s32.totalorder %s885_s3, %s878_s20 }
  0x2a   : > { %p882_p11 = pneg %p881_p5  ;;  %p888_p7 = por %p887_p4, %p886_p9 }
  0x2c   : > { %p889_p10 = pnand %p888_p7, %p882_p11 }
  0x2e   : > { %892 = shalt.err (!%p889_p10)
}
  0x2f   : > { %s1012_s7 = smov 128   ;;  %s1013_s8 = smov 8  }
  0x30   : > { %800 = dma.hbm_to_vmem [thread:$0]  (!%p1115_p0), %s1107_s30, 2048, %s1111_s4, %s156_s6, %s1012_s7, %s1012_s7, %s1013_s8  }
  0x31   : > { %p201_p9 = scmp.lt.s32.totalorder %s1009_s14, 3  ;;  %s1157_s18 = scalar_lea.hbm %s1330_s1, %s652_s27 }
  0x32   : > { %p1339_p11 = scmp.ge.s32.totalorder %s1009_s14, 1  ;;  %s183_s20 = scalar_lea.vmem [#allocation5], %s637_s26 }
  0x33   : > { %s193_s28 = sshll.u32 %s183_s20, 4  ;;  %s180_s30 = scalar_lea.sflag [#allocation6], %s1098_s25  ;;  %s1167_s28 = int_to_ptr.vmem [resolvable:$true] %s193_s28 }
  0x34   : > { %p1161_p12 = pnand %p1339_p11, %p201_p9  ;;  %s893_s4 = scalar_lea.hbm %s1157_s18, 2048 }
  0x35   : > { %p894_p1 = scmp.ne.s32.totalorder %s1157_s18, %s893_s4  ;;  %s898_s29 = scalar_lea.hbm %s1330_s1, 4096 }
  0x36   : > { %p899_p2 = scmp.lt.u32.totalorder %s1157_s18, %s1330_s1  ;;  %p900_p5 = scmp.lt.u32.totalorder %s898_s29, %s893_s4 }
  0x37   : > { %p896_p6 = pnand %p894_p1, %p865_p3  ;;  %p902_p7 = scmp.lt.u32.totalorder %s893_s4, %s1157_s18 }
  0x38   : > { %p901_p4 = por %p900_p5, %p899_p2 }
  0x39   : > { %p897_p13 = pneg %p896_p6 }
  0x3a   : > { %p903_p10 = por %p902_p7, %p901_p4 }
  0x3c   : > { %p904_p9 = pnand %p903_p10, %p897_p13 }
  0x3e   : > { %907 = shalt.err (!%p904_p9)
}
  0x3f   : > { %s908_s26 = scalar_lea.vmem %s1167_s28, 2048  ;;  %s1014_s16 = smov [#allocation5]  }
  0x40   : > { %p909_p11 = scmp.ne.s32.totalorder %s1167_s28, %s908_s26  ;;  %s913_s20 = sshll.u32 %s1014_s16, 4  ;;  %s914_s20 = int_to_ptr.vmem [resolvable:$false] %s913_s20 }
  0x41   : > { %s915_s27 = scalar_lea.vmem %s914_s20, 4096  ;;  %p916_p8 = scmp.lt.s32.totalorder %s1167_s28, %s914_s20 }
  0x42   : > { %p911_p1 = pnand %p909_p11, %p865_p3  ;;  %p917_p2 = scmp.lt.s32.totalorder %s915_s27, %s908_s26 }
  0x44   : > { %p912_p6 = pneg %p911_p1  ;;  %p918_p5 = por %p917_p2, %p916_p8 }
  0x46   : > { %p919_p4 = pnand %p918_p5, %p912_p6 }
  0x48   : > { %922 = shalt.err (!%p919_p4)
}
  0x49   : > { %803 = dma.hbm_to_vmem [thread:$0]  (!%p1115_p0), %s1157_s18, 2048, %s1167_s28, %s180_s30, %s1012_s7, %s1012_s7, %s1013_s8  }
  0x4a   : > { %205 = sbr.rel (%p1161_p12) target bundleno = 359 (0x167), region = 28  ;;  %s1201_s4 = sand.u32 (!%p1161_p12), 1, %s993_s10  }
  0x4b   : > { %s1204_s6 = sshll.u32 (!%p1161_p12), %s1201_s4, 7  ;;  %s208_s5 = scalar_lea.sflag (!%p1161_p12), [#allocation3], %s1201_s4 }
  0x4c   : > { %s1208_s29 = scalar_lea.vmem (!%p1161_p12), [#allocation2], %s1204_s6  ;;  %p1341_p8 = scmp.ne.s32.totalorder (!%p1161_p12), %s1335_s21, 0 }
  0x51   : > { %976 = dma.done.wait (%p1341_p8), %s208_s5, 2048  }
  0x52   : > { %978 = vsyncadd (%p1341_p8), %s208_s5, 4294965248  ;;  %s217_s25 = scalar_lea.sflag [#allocation6], %s1201_s4  ;;  %s1216_s7 = scalar_lea.vmem [#allocation5], %s1204_s6 }
  0x53   : > { %980 = dma.done.wait (%p1341_p8), %s217_s25, 2048  }
  0x54   : > { %982 = vsyncadd (%p1341_p8), %s217_s25, 4294965248  ;;  %v301_v0 = vld [vmem:[%s1216_s7] sm:$0xff]  ;;  %v302_v1 = vld [vmem:[%s1216_s7 + $0x8] sm:$0xff]  ;;  %s1255_s21 = scalar_lea.vmem [#allocation7], %s1204_s6  ;;  %s654_s8 = sshll.u32 %s1001_s12, 11 }
  0x55   : > { %v303_v2 = vld [vmem:[%s1216_s7 + $0x10] sm:$0xff]  ;;  %v743_v3 = vpack.c.bf16 %v302_v1, %v301_v0  ;;  %v304_v4 = vld [vmem:[%s1216_s7 + $0x18] sm:$0xff]  ;;  %v305_v6 = vld [vmem:[%s1216_s7 + $0x20] sm:$0xff]  ;;  %s511_s18 = sshll.u32 %s1255_s21, 4  ;;  %s1274_s30 = scalar_lea.hbm %s1331_s2, %s654_s8  ;;  %s1276_s18 = int_to_ptr.vmem [resolvable:$true] %s511_s18 }
  0x56   : > { %v747_v5 = vpack.c.bf16 %v304_v4, %v303_v2  ;;  %v306_v7 = vld [vmem:[%s1216_s7 + $0x28] sm:$0xff]  ;;  %v285_v9 = vld [vmem:[%s1208_s29] sm:$0xff]  ;;  %v307_v11 = vld [vmem:[%s1216_s7 + $0x30] sm:$0xff]  ;;  %s495_s12 = scalar_lea.sflag [#allocation4], %s1201_s4  ;;  %s923_s3 = scalar_lea.vmem %s1276_s18, 2048 }
  0x57   : > { %744 = vmatprep.subr.bf16.mxu0 %v743_v3  ;;  %775 = vmatprep.subr.bf16.mxu1 %v743_v3  ;;  %v751_v8 = vpack.c.bf16 %v306_v7, %v305_v6  ;;  %v293_v10 = vld [vmem:[%s1208_s29 + $0x40] sm:$0xff]  ;;  %v308_v12 = vld [vmem:[%s1216_s7 + $0x38] sm:$0xff]  ;;  %v310_v15 = vld [vmem:[%s1216_s7 + $0x48] sm:$0xff]  ;;  %p924_p0 = scmp.ne.s32.totalorder %s1276_s18, %s923_s3  ;;  %p1342_p3 = scmp.ne.s32.totalorder %s1336_s22, 0 }
  0x58   : > { %746 = vmatpush3.bf16.msra.mxu0 %v743_v3  ;;  %783 = vmatpush3.bf16.msra.mxu1 %v743_v3  ;;  %v755_v13 = vpack.c.bf16 %v308_v12, %v307_v11  ;;  %v309_v14 = vld [vmem:[%s1216_s7 + $0x40] sm:$0xff]  ;;  %v311_v17 = vld [vmem:[%s1216_s7 + $0x50] sm:$0xff]  ;;  %v312_v18 = vld [vmem:[%s1216_s7 + $0x58] sm:$0xff]  ;;  %s1015_s15 = smov [#allocation7]  }
  0x59   : > { %748 = vmatprep.subr.bf16.mxu0 %v747_v5  ;;  %776 = vmatprep.subr.bf16.mxu1 %v747_v5  ;;  %v759_v16 = vpack.c.bf16 %v310_v15, %v309_v14  ;;  %v763_v19 = vpack.c.bf16 %v312_v18, %v311_v17  ;;  %v313_v20 = vld [vmem:[%s1216_s7 + $0x60] sm:$0xff]  ;;  %v314_v21 = vld [vmem:[%s1216_s7 + $0x68] sm:$0xff]  ;;  %v315_v23 = vld [vmem:[%s1216_s7 + $0x70] sm:$0xff]  ;;  %p925_p12 = pnand %p924_p0, %p1342_p3  ;;  %s927_s26 = sshll.u32 %s1015_s15, 4  ;;  %s928_s26 = int_to_ptr.vmem [resolvable:$false] %s927_s26 }
  0x5a   : > { %719 = vmatprep.mubr.f32.mxu0 %v285_v9  ;;  %731 = vmatprep.mubr.f32.mxu1 %v293_v10  ;;  %v767_v22 = vpack.c.bf16 %v314_v21, %v313_v20  ;;  %v316_v24 = vld [vmem:[%s1216_s7 + $0x78] sm:$0xff]  ;;  %v286_v26 = vld [vmem:[%s1208_s29 + $0x8] sm:$0xff]  ;;  %v287_v28 = vld [vmem:[%s1208_s29 + $0x10] sm:$0xff]  ;;  %s929_s16 = scalar_lea.vmem %s928_s26, 4096  ;;  %p930_p7 = scmp.lt.s32.totalorder %s1276_s18, %s928_s26 }
  0x5b   : > { %v771_v25 = vpack.c.bf16 %v316_v24, %v315_v23  ;;  %v294_v27 = vld [vmem:[%s1208_s29 + $0x48] sm:$0xff]  ;;  %v295_v29 = vld [vmem:[%s1208_s29 + $0x50] sm:$0xff]  ;;  %v288_v30 = vld [vmem:[%s1208_s29 + $0x18] sm:$0xff]  ;;  %p926_p13 = pneg %p925_p12  ;;  %p931_p10 = scmp.lt.s32.totalorder %s929_s16, %s923_s3 }
  0x5c   : > { %750 = vmatpush3.bf16.msra.mxu0 %v747_v5  ;;  %784 = vmatpush3.bf16.msra.mxu1 %v747_v5  ;;  %v296_v31 = vld [vmem:[%s1208_s29 + $0x58] sm:$0xff]  ;;  %v289_v32 = vld [vmem:[%s1208_s29 + $0x20] sm:$0xff]  ;;  %v290_v34 = vld [vmem:[%s1208_s29 + $0x28] sm:$0xff] }
  0x5d   : > { %752 = vmatprep.subr.bf16.mxu0 %v751_v8  ;;  %777 = vmatprep.subr.bf16.mxu1 %v751_v8  ;;  %v297_v33 = vld [vmem:[%s1208_s29 + $0x60] sm:$0xff]  ;;  %v298_v35 = vld [vmem:[%s1208_s29 + $0x68] sm:$0xff]  ;;  %v291_v36 = vld [vmem:[%s1208_s29 + $0x30] sm:$0xff]  ;;  %p932_p9 = por %p931_p10, %p930_p7 }
  0x5e   : > { %v299_v37 = vld [vmem:[%s1208_s29 + $0x70] sm:$0xff]  ;;  %v292_v38 = vld [vmem:[%s1208_s29 + $0x38] sm:$0xff] }
  0x5f   : > { %v300_v39 = vld [vmem:[%s1208_s29 + $0x78] sm:$0xff]  ;;  %p933_p11 = pnand %p932_p9, %p926_p13 }
  0x60   : > { %754 = vmatpush3.bf16.msra.mxu0 %v751_v8  ;;  %785 = vmatpush3.bf16.msra.mxu1 %v751_v8 }
  0x61   : > { %756 = vmatprep.subr.bf16.mxu0 %v755_v13  ;;  %778 = vmatprep.subr.bf16.mxu1 %v755_v13 }
  0x64   : > { %758 = vmatpush3.bf16.msra.mxu0 %v755_v13  ;;  %786 = vmatpush3.bf16.msra.mxu1 %v755_v13 }
  0x65   : > { %760 = vmatprep.subr.bf16.mxu0 %v759_v16  ;;  %779 = vmatprep.subr.bf16.mxu1 %v759_v16 }
  0x68   : > { %762 = vmatpush3.bf16.msra.mxu0 %v759_v16  ;;  %787 = vmatpush3.bf16.msra.mxu1 %v759_v16 }
  0x69   : > { %764 = vmatprep.subr.bf16.mxu0 %v763_v19  ;;  %780 = vmatprep.subr.bf16.mxu1 %v763_v19 }
  0x6c   : > { %766 = vmatpush3.bf16.msra.mxu0 %v763_v19  ;;  %788 = vmatpush3.bf16.msra.mxu1 %v763_v19 }
  0x6d   : > { %768 = vmatprep.subr.bf16.mxu0 %v767_v22  ;;  %781 = vmatprep.subr.bf16.mxu1 %v767_v22 }
  0x70   : > { %770 = vmatpush3.bf16.msra.mxu0 %v767_v22  ;;  %789 = vmatpush3.bf16.msra.mxu1 %v767_v22 }
  0x71   : > { %772 = vmatprep.subr.bf16.mxu0 %v771_v25  ;;  %782 = vmatprep.subr.bf16.mxu1 %v771_v25 }
  0x74   : > { %774 = vmatpush3.bf16.msra.mxu0 %v771_v25  ;;  %790 = vmatpush3.bf16.msra.mxu1 %v771_v25 }
  0x77   : > { %720 = vmatmul.mubr.f32.vlgmr.msra.gmra.mrb[0].mxu0 %v286_v26  ;;  %732 = vmatmul.mubr.f32.vlgmr.msra.gmra.mrb[0].mxu1 %v294_v27 }
  0x78   : > { %722 = vmatprep.mubr.f32.mxu0 %v287_v28  ;;  %734 = vmatprep.mubr.f32.mxu1 %v295_v29 }
  0x7b   : > { %723 = vmatmul.mubr.f32.gmra.mrb[2].mxu0 %v288_v30  ;;  %735 = vmatmul.mubr.f32.gmra.mrb[2].mxu1 %v296_v31 }
  0x7c   : > { %725 = vmatprep.mubr.f32.mxu0 %v289_v32  ;;  %737 = vmatprep.mubr.f32.mxu1 %v297_v33 }
  0x7f   : > { %726 = vmatmul.mubr.f32.gmra.mrb[4].mxu0 %v290_v34  ;;  %738 = vmatmul.mubr.f32.gmra.mrb[4].mxu1 %v298_v35 }
  0x80   : > { %728 = vmatprep.mubr.f32.mxu0 %v291_v36  ;;  %740 = vmatprep.mubr.f32.mxu1 %v299_v37 }
  0x83   : > { %729 = vmatmul.mubr.f32.gmra.mrb[6].mxu0 %v292_v38  ;;  %741 = vmatmul.mubr.f32.gmra.mrb[6].mxu1 %v300_v39 }
 0x14a   : > { %v721_v40 = vpop.f32.mrb[0].mxu0  ;;  %v733_v41 = vpop.f32.mrb[0].mxu1 }
 0x14b   : > { %v383_v42 = vpop.f32.mrb[1].mxu0  ;;  %v423_v43 = vpop.f32.mrb[1].mxu1  ;;  %479 = vst [vmem:[%s1255_s21 + $0x8] sm:$0xff] %v721_v40  ;;  %487 = vst [vmem:[%s1255_s21 + $0x48] sm:$0xff] %v733_v41 }
 0x14c   : > { %478 = vst [vmem:[%s1255_s21] sm:$0xff] %v383_v42  ;;  %486 = vst [vmem:[%s1255_s21 + $0x40] sm:$0xff] %v423_v43 }
 0x14e   : > { %v724_v44 = vpop.f32.mrb[2].mxu0  ;;  %v736_v45 = vpop.f32.mrb[2].mxu1 }
 0x14f   : > { %v393_v46 = vpop.f32.mrb[3].mxu0  ;;  %v433_v47 = vpop.f32.mrb[3].mxu1  ;;  %481 = vst [vmem:[%s1255_s21 + $0x18] sm:$0xff] %v724_v44  ;;  %489 = vst [vmem:[%s1255_s21 + $0x58] sm:$0xff] %v736_v45 }
 0x150   : > { %480 = vst [vmem:[%s1255_s21 + $0x10] sm:$0xff] %v393_v46  ;;  %488 = vst [vmem:[%s1255_s21 + $0x50] sm:$0xff] %v433_v47 }
 0x152   : > { %v727_v48 = vpop.f32.mrb[4].mxu0  ;;  %v739_v49 = vpop.f32.mrb[4].mxu1 }
 0x153   : > { %v403_v50 = vpop.f32.mrb[5].mxu0  ;;  %v443_v51 = vpop.f32.mrb[5].mxu1  ;;  %483 = vst [vmem:[%s1255_s21 + $0x28] sm:$0xff] %v727_v48  ;;  %491 = vst [vmem:[%s1255_s21 + $0x68] sm:$0xff] %v739_v49 }
 0x154   : > { %482 = vst [vmem:[%s1255_s21 + $0x20] sm:$0xff] %v403_v50  ;;  %490 = vst [vmem:[%s1255_s21 + $0x60] sm:$0xff] %v443_v51 }
 0x156   : > { %v730_v52 = vpop.f32.mrb[6].mxu0  ;;  %v742_v53 = vpop.f32.mrb[6].mxu1 }
 0x157   : > { %v413_v54 = vpop.f32.mrb[7].mxu0  ;;  %v453_v55 = vpop.f32.mrb[7].mxu1  ;;  %485 = vst [vmem:[%s1255_s21 + $0x38] sm:$0xff] %v730_v52  ;;  %493 = vst [vmem:[%s1255_s21 + $0x78] sm:$0xff] %v742_v53 }
 0x158   : > { %484 = vst [vmem:[%s1255_s21 + $0x30] sm:$0xff] %v413_v54  ;;  %492 = vst [vmem:[%s1255_s21 + $0x70] sm:$0xff] %v453_v55 }
 0x159   : > { %936 = shalt.err (!%p933_p11)
}
 0x15a   : > { %s937_s20 = scalar_lea.hbm %s1274_s30, 2048  ;;  %s941_s5 = scalar_lea.hbm %s1331_s2, 4096 }
 0x15b   : > { %p938_p1 = scmp.ne.s32.totalorder %s1274_s30, %s937_s20  ;;  %p942_p5 = scmp.lt.u32.totalorder %s1274_s30, %s1331_s2 }
 0x15c   : > { %p943_p4 = scmp.lt.u32.totalorder %s941_s5, %s937_s20  ;;  %p945_p0 = scmp.lt.u32.totalorder %s937_s20, %s1274_s30 }
 0x15d   : > { %p939_p6 = pnand %p938_p1, %p1342_p3 }
 0x15e   : > { %p944_p8 = por %p943_p4, %p942_p5 }
 0x15f   : > { %p940_p2 = pneg %p939_p6 }
 0x160   : > { %p946_p12 = por %p945_p0, %p944_p8 }
 0x162   : > { %p947_p13 = pnand %p946_p12, %p940_p2 }
 0x164   : > { %950 = shalt.err (!%p947_p13)
}
 0x165   : > { %s1016_s7 = smov 128   ;;  %s1017_s21 = smov 8  }
 0x166   : > { %795 = dma.vmem_to_hbm [thread:$0]  (%p1342_p3), %s1276_s18, 2048, %s1274_s30, %s495_s12, %s1016_s7, %s1016_s7, %s1017_s21  }
 0x167 PF: > { %s526_s8 = sand.u32 1, %s989_s9   ;;  %p1343_p7 = scmp.ne.s32.totalorder %s1337_s24, 0 }
 0x168   : > { %p1344_p10 = scmp.ge.s32.totalorder %s1009_s14, 2  ;;  %s527_s19 = scalar_lea.sflag [#allocation4], %s526_s8 }
 0x16a   : > { %p805_p9 = pnand %p1344_p10, %p1343_p7 }
 0x16c   : > { %984 = dma.done.wait (!%p805_p9), %s527_s19, 2048  }
 0x16d   : > { %986 = vsyncadd (!%p805_p9), %s527_s19, 4294965248  ;;  %s21_s14 = sadd.s32 1, %s1009_s14   ;;  %s1345_s9 = smov %s993_s10 }
 0x16e   : > { %p18_p11 = scmp.ge.s32.totalorder %s21_s14, 4   ;;  %s1346_s10 = smov %s997_s11 }
 0x16f   : > { %s1347_s11 = smov %s1089_s23  ;;  %s1348_s12 = smov %s1005_s13 }
 0x170   : > { %s1349_s13 = smov %s1351_s17  ;;  %20 = sbr.rel (!%p18_p11) target bundleno = 8 (0x8), region = 90 }
 0x177   :  { %532 = vsyncpa [#allocation3], 1 }
 0x178   :  { %534 = vsyncpa [#allocation3 + $0x1], 1 }
 0x179   :  { %535 = vsyncpa [#allocation6], 1 }
 0x17a   :  { %537 = vsyncpa [#allocation6 + $0x1], 1 }
 0x17b   :  { %538 = vsyncpa [#allocation4], 1 }
 0x17c   :  { %540 = vsyncpa [#allocation4 + $0x1], 1 }

</bundles_post_ra>
